<compile_context>
chip_gen: v7x
topology: tpu7x:2x2x1
jax: 0.10.0
libtpu: 0.0.40
codegen_flags: <defaults>
</compile_context>

<pallas_src>
import jax
import jax.numpy as jnp
from jax.experimental import pallas as pl
from jax.experimental.pallas import tpu as pltpu


def _copy_kernel(x_ref, o_ref):
    # Single contiguous, lane-dense block copy (pure data movement).
    o_ref[...] = x_ref[...]


def multi_scale_patcher(signal: jax.Array, input_len: int, scales=(1, 2, 4, 8)):
    """JAX/Pallas equivalent of MultiScalePatcher.forward.

    Args:
      signal: [batch, channels, time] array.
      input_len: the `input_len` constructor argument of the PyTorch module.
      scales: list of scales.

    Returns:
      list of arrays, one per scale, each [batch, channels, num_patches, patch_size].
    """
    B, C, T = signal.shape

    patch_sizes = [input_len // s for s in scales]
    for s, ps in zip(scales, patch_sizes):
        if ps <= 0:
            raise ValueError(f"scale {s}: patch_size {ps} must be positive")
        if T < ps:
            raise ValueError(
                f"scale {s}: time_steps {T} < patch_size {ps} (unfold would be empty)"
            )

    # torch.unfold count with step == size; used_s = n_s * ps_s (contiguous prefix).
    num_patches = [(T - ps) // ps + 1 for ps in patch_sizes]
    used = [n * ps for n, ps in zip(num_patches, patch_sizes)]
    max_used = max(used)

    rows = B * C
    x2d = signal.reshape(rows, T)               # free (contiguous) reshape
    if max_used != T:
        # Drop the never-read tail so the kernel only DMAs the used window.
        x2d = jax.lax.slice(x2d, (0, 0), (rows, max_used))

    # Lane-dense, VMEM-friendly tiling: <= 256 x 2048 f32 = 2 MiB per buffer,
    # so 2 input + 2 output double-buffers stay well under 16 MiB (v5e scoped)
    # and 64 MiB (v7x physical).  Full-extent blocks are used for small dims.
    row_tile = rows if rows <= 256 else 256          # multiple of 8 or full dim
    t_tile = max_used if max_used <= 2048 else 2048  # multiple of 128 or full dim
    grid = (pl.cdiv(rows, row_tile), pl.cdiv(max_used, t_tile))

    out2d = pl.pallas_call(
        _copy_kernel,
        out_shape=jax.ShapeDtypeStruct((rows, max_used), signal.dtype),
        grid=grid,
        in_specs=[pl.BlockSpec((row_tile, t_tile), lambda i, j: (i, j))],
        out_specs=pl.BlockSpec((row_tile, t_tile), lambda i, j: (i, j)),
        compiler_params=pltpu.CompilerParams(
            dimension_semantics=("parallel", "parallel"),
            vmem_limit_bytes=32 * 1024 * 1024,
        ),
    )(x2d)

    full = out2d.reshape(B, C, max_used)

    # Per-scale "unfold" = reshape of the (single) copied buffer, mirroring the
    # view semantics of torch.Tensor.unfold with step == size.
    patches = []
    for ps, n, u in zip(patch_sizes, num_patches, used):
        src = full if u == max_used else full[:, :, :u]
        patches.append(src.reshape(B, C, n, ps))
    return patches


def _reference_unfold(signal, input_len, scales):
    """Pure-JAX reference matching torch.Tensor.unfold(-1, ps, ps)."""
    B, C, T = signal.shape
    refs = []
    for scale in scales:
        ps = input_len // scale
        n = (T - ps) // ps + 1
        refs.append(signal[:, :, : n * ps].reshape(B, C, n, ps))
    return refs


if __name__ == "__main__":
    # Small deterministic example: batch=2, channels=4, time=input_len=16.
    key = jax.random.PRNGKey(0)
    B, C, T = 2, 4, 16
    input_len = 16
    scales = [1, 2, 4, 8]

    signal = jax.random.normal(key, (B, C, T), dtype=jnp.float32)

    patches = multi_scale_patcher(signal, input_len, scales)
    patches = [jax.block_until_ready(p) for p in patches]

    refs = _reference_unfold(signal, input_len, scales)
    for p, r, s in zip(patches, refs, scales):
        assert p.shape == r.shape, (s, p.shape, r.shape)
        assert jnp.allclose(p, r), f"mismatch at scale {s}"

    print("KERNEL_OK")
</pallas_src>

<mosaic_0001>
module attributes {stable_mosaic.version = 11 : i64} {
  func.func @_copy_kernel(%arg0: i32, %arg1: i32, %arg2: memref<8x16xf32, #tpu.memory_space<vmem>>, %arg3: memref<8x16xf32, #tpu.memory_space<vmem>>) attributes {dimension_semantics = [#tpu.dimension_semantics<parallel>, #tpu.dimension_semantics<parallel>], iteration_bounds = array<i64: 1, 1>, scalar_prefetch = 0 : i64, scratch_operands = 0 : i64, tpu.core_type = #tpu.core_type<tc>, window_params = [{transform_indices = @transform_0, window_bounds = array<i64: 8, 16>}, {transform_indices = @transform_1, window_bounds = array<i64: 8, 16>}]} {
    %c0 = arith.constant 0 : index
    %c0_0 = arith.constant 0 : index
    %0 = vector.load %arg2[%c0, %c0_0] : memref<8x16xf32, #tpu.memory_space<vmem>>, vector<8x16xf32>
    %c0_1 = arith.constant 0 : index
    %c0_2 = arith.constant 0 : index
    %1 = vector.load %arg3[%c0_1, %c0_2] : memref<8x16xf32, #tpu.memory_space<vmem>>, vector<8x16xf32>
    tpu.vector_store %arg3[%c0_1, %c0_2], %0 {strides = array<i32>} : memref<8x16xf32, #tpu.memory_space<vmem>>, vector<8x16xf32>,
    return
  }
  func.func @transform_0(%arg0: i32, %arg1: i32) -> (i32, i32) {
    %c0_i32 = arith.constant 0 : i32
    return %arg0, %arg1 : i32, i32
  }
  func.func @transform_1(%arg0: i32, %arg1: i32) -> (i32, i32) {
    %c0_i32 = arith.constant 0 : i32
    return %arg0, %arg1 : i32, i32
  }
}

</mosaic_0001>

<bundles_post_ra>
// kernel: tpu_custom_call.1
= control target key start
LH: loop header
LB: loop body
LE: loop exit
PB: predicated region body
PF: predicated region fallthrough
CT: control target
= control target key end

     0   :  { %6 = vsyncpa [#allocation3], 0  ;;  %s125_s0 = inlined_call_operand.hbm [shape: f32[8,16], index: 0, kind: input, shape index: {}]   ;;  %s126_s1 = inlined_call_operand.hbm [shape: f32[8,16], index: 1, kind: output, shape index: {}]  }
   0x1   :  { %7 = vsyncpa [#allocation4], 0  ;;  %s89_s6 = smov [#allocation2]   ;;  %s41_s10 = scalar_lea.hbm %s125_s0, 128 }
   0x2   :  { %s14_s7 = sshll.u32 %s89_s6, 4  ;;  %p42_p0 = scmp.ne.s32.totalorder %s125_s0, %s41_s10  ;;  %s15_s7 = int_to_ptr.vmem [resolvable:$true] %s14_s7 }
   0x3   :  { %p45_p1 = scmp.lt.u32.totalorder %s41_s10, %s125_s0 }
   0x5   :  { %p47_p2 = pnand %p45_p1, %p42_p0 }
   0x7   :  { %50 = shalt.err (!%p47_p2)
}
   0x8   :  { %s51_s15 = scalar_lea.vmem %s15_s7, 128  ;;  %p56_p4 = scmp.lt.s32.totalorder %s15_s7, %s15_s7 }
   0x9   :  { %p52_p3 = scmp.ne.s32.totalorder %s15_s7, %s51_s15  ;;  %p57_p5 = scmp.lt.s32.totalorder %s51_s15, %s51_s15 }
   0xb   :  { %p58_p6 = por %p57_p5, %p56_p4 }
   0xd   :  { %p59_p7 = pnand %p58_p6, %p52_p3 }
   0xf   :  { %62 = shalt.err (!%p59_p7)
}
  0x10   :  { %17 = dma.hbm_to_vmem [thread:$0]  %s125_s0, 128, %s15_s7, [#allocation3]  }
  0x11   :  { %85 = dma.done.wait [#allocation3], 128  }
  0x12   :  { %86 = vsyncadd [#allocation3], 4294967168  ;;  %s90_s18 = smov [#allocation5]   ;;  %vm22_vm0 = vcmask 130048   ;;  %v21_v0 = vld [vmem:[#allocation2] sm:$0xff] }
  0x13   :  { %s30_s19 = sshll.u32 %s90_s18, 4  ;;  %23 = vst.msk [vmem:[#allocation5] sm:$0xff] %vm22_vm0, %v21_v0  ;;  %s31_s19 = int_to_ptr.vmem [resolvable:$true] %s30_s19 }
  0x14   :  { %s63_s20 = scalar_lea.vmem %s31_s19, 128  ;;  %p68_p9 = scmp.lt.s32.totalorder %s31_s19, %s31_s19 }
  0x15   :  { %p64_p8 = scmp.ne.s32.totalorder %s31_s19, %s63_s20  ;;  %p69_p10 = scmp.lt.s32.totalorder %s63_s20, %s63_s20 }
  0x17   :  { %p70_p11 = por %p69_p10, %p68_p9 }
  0x19   :  { %p71_p12 = pnand %p70_p11, %p64_p8 }
  0x1b   :  { %74 = shalt.err (!%p71_p12)
}
  0x1c   :  { %s75_s23 = scalar_lea.hbm %s126_s1, 128 }
  0x1d   :  { %p76_p13 = scmp.ne.s32.totalorder %s126_s1, %s75_s23  ;;  %p79_p0 = scmp.lt.u32.totalorder %s75_s23, %s126_s1 }
  0x1f   :  { %p81_p1 = pnand %p79_p0, %p76_p13 }
  0x21   :  { %84 = shalt.err (!%p81_p1)
}
  0x22   :  { %33 = dma.vmem_to_hbm [thread:$0]  %s31_s19, 128, %s126_s1, [#allocation4]  }
  0x23   :  { %87 = dma.done.wait [#allocation4], 128  }
  0x24   :  { %88 = vsyncadd [#allocation4], 4294967168 }
  0x25   :  { %37 = vsyncpa [#allocation3], 1 }
  0x26   :  { %38 = vsyncpa [#allocation4], 1 }

</bundles_post_ra>
